<compile_context>
chip_gen: v7x
topology: tpu7x:2x2x1
jax: 0.10.0
libtpu: 0.0.40
codegen_flags: <defaults>
</compile_context>

<pallas_src>
import functools
import math

import jax
import jax.numpy as jnp
from jax.experimental import pallas as pl
from jax.experimental.pallas import tpu as pltpu


def _round_up(x, m):
    return (x + m - 1) // m * m


def _pick_tile(dim, unit, max_tile):
    """Largest multiple-of-`unit` divisor of round_up(dim, unit) <= max_tile.

    Keeps tiles big (fewer ~0.35us grid steps, large DMAs) without padding the
    problem dims by whole tiles (which would add real MXU FLOPs)."""
    padded = _round_up(dim, unit)
    n = padded // unit
    best = 1
    for d in range(1, n + 1):
        if n % d == 0 and d * unit <= max_tile:
            best = d
    return best * unit, padded


def _batch_layout(B):
    """Pad batch to sublanes and pick the number of batch grid blocks.

    v7x has two TensorCores; a leading "parallel" batch axis lets each core run
    the (batch-independent) recurrence on half the rows.  Only split when the
    halves stay 16-row aligned (bf16 sublane packing); otherwise nb=1, which is
    what single-TC v5e/v6e effectively use anyway."""
    Bp = _round_up(B, 8)
    if Bp % 32 == 0:
        return Bp, 2
    return Bp, 1


# --------------------------- tiled MXU matmul -------------------------------

def _matmul_bias_kernel(a_ref, b_ref, bias_ref, o_ref, acc_ref):
    @pl.when(pl.program_id(2) == 0)
    def _():
        acc_ref[...] = jnp.zeros_like(acc_ref)

    acc_ref[...] += jnp.dot(a_ref[...], b_ref[...],
                            preferred_element_type=jnp.float32)

    @pl.when(pl.program_id(2) == pl.num_programs(2) - 1)
    def _():
        # Bias fused in the epilogue: no separate HBM pass over the output.
        o_ref[...] = (acc_ref[...] + bias_ref[...]).astype(o_ref.dtype)


def pallas_matmul(a, b, bias=None, out_dtype=jnp.float32,
                  tm_max=512, tn_max=512, tk_max=1024):
    """a: (M, K), b: (K, N).  bf16 operands, f32 accumulation, fused bias."""
    M, K = a.shape
    _, N = b.shape
    a = a.astype(jnp.bfloat16)
    b = b.astype(jnp.bfloat16)

    tm, Mp = _pick_tile(M, 16, tm_max)    # 16: bf16 sublane packing
    tn, Np = _pick_tile(N, 128, tn_max)
    tk, Kp = _pick_tile(K, 128, tk_max)

    a_p = jnp.pad(a, ((0, Mp - M), (0, Kp - K)))
    b_p = jnp.pad(b, ((0, Kp - K), (0, Np - N)))
    if bias is None:
        bias_p = jnp.zeros((1, Np), jnp.float32)
    else:
        bias_p = jnp.pad(bias.astype(jnp.float32).reshape(1, N),
                         ((0, 0), (0, Np - N)))

    out = pl.pallas_call(
        _matmul_bias_kernel,
        out_shape=jax.ShapeDtypeStruct((Mp, Np), out_dtype),
        grid=(Mp // tm, Np // tn, Kp // tk),
        in_specs=[pl.BlockSpec((tm, tk), lambda i, j, k: (i, k)),
                  pl.BlockSpec((tk, tn), lambda i, j, k: (k, j)),
                  pl.BlockSpec((1, tn), lambda i, j, k: (0, j))],
        out_specs=pl.BlockSpec((tm, tn), lambda i, j, k: (i, j)),
        scratch_shapes=[pltpu.VMEM((tm, tn), jnp.float32)],
        compiler_params=pltpu.CompilerParams(
            dimension_semantics=("parallel", "parallel", "arbitrary")),
    )(a_p, b_p, bias_p)
    return out[:M, :N]


# --------------------------- LSTM recurrence --------------------------------

def _lstm_chunk_kernel(gx_ref, whh_ref, h0_ref, c0_ref, mask_ref,
                       y_ref, yd_ref, h_ref, c_ref):
    """Tc LSTM steps per grid point.  Grid = (batch blocks, time chunks).

    gx_ref : (Tc, Bb, 4*Hp) bf16 — precomputed x @ W_ih + bias, gates (i,f,o,g)
    whh_ref: (Hp, 4*Hp)     bf16 — recurrent weights (WeightDrop applied)
    mask_ref: (Bb, Hp)      f32  — variational dropout mask for this layer's out
    h/c     : (Bb, Hp)      f32  — resident accumulators (constant index over t)
    y / yd  : raw (f32) and dropped (bf16) output streams.
    """
    @pl.when(pl.program_id(1) == 0)
    def _():
        h_ref[...] = h0_ref[...]
        c_ref[...] = c0_ref[...]

    tc = gx_ref.shape[0]
    hp = h_ref.shape[1]

    def step(s, carry):
        # Keep h/c in the resident VMEM output blocks (bounds vreg pressure).
        h = h_ref[...]
        c = c_ref[...]
        gates = gx_ref[s].astype(jnp.float32) + jnp.dot(
            h.astype(jnp.bfloat16), whh_ref[...],
            preferred_element_type=jnp.float32)
        sig = jax.nn.sigmoid(gates[:, :3 * hp])       # i, f, o in one slab
        i_g = sig[:, 0 * hp:1 * hp]
        f_g = sig[:, 1 * hp:2 * hp]
        o_g = sig[:, 2 * hp:3 * hp]
        g_g = jnp.tanh(gates[:, 3 * hp:4 * hp])
        c_new = f_g * c + i_g * g_g
        h_new = o_g * jnp.tanh(c_new)
        h_ref[...] = h_new
        c_ref[...] = c_new
        y_ref[s] = h_new
        # Fused variational dropout on the layer output (free VPU filler).
        yd_ref[s] = (h_new * mask_ref[...]).astype(yd_ref.dtype)
        return carry

    jax.lax.fori_loop(0, tc, step, 0, unroll=2)


def _lstm_call(gx, w_hh_bf, h0_p, c0_p, mask_p, tc, nb, single_buffer=True):
    T, Bp, G4 = gx.shape
    Hp = h0_p.shape[1]
    Bb = Bp // nb

    def const_spec(shape, idx):
        # Single-buffer constant/per-batch-block inputs (their index never
        # changes along the sequential time axis) — no 2x VMEM waste.
        if single_buffer:
            return pl.BlockSpec(shape, idx, pipeline_mode=pl.Buffered(1))
        return pl.BlockSpec(shape, idx)

    return pl.pallas_call(
        _lstm_chunk_kernel,
        out_shape=(jax.ShapeDtypeStruct((T, Bp, Hp), jnp.float32),
                   jax.ShapeDtypeStruct((T, Bp, Hp), jnp.bfloat16),
                   jax.ShapeDtypeStruct((Bp, Hp), jnp.float32),
                   jax.ShapeDtypeStruct((Bp, Hp), jnp.float32)),
        grid=(nb, T // tc),
        in_specs=[
            pl.BlockSpec((tc, Bb, G4), lambda b, t: (t, b, 0)),
            const_spec((Hp, G4), lambda b, t: (0, 0)),
            const_spec((Bb, Hp), lambda b, t: (b, 0)),
            const_spec((Bb, Hp), lambda b, t: (b, 0)),
            const_spec((Bb, Hp), lambda b, t: (b, 0)),
        ],
        out_specs=(
            pl.BlockSpec((tc, Bb, Hp), lambda b, t: (t, b, 0)),
            pl.BlockSpec((tc, Bb, Hp), lambda b, t: (t, b, 0)),
            pl.BlockSpec((Bb, Hp), lambda b, t: (b, 0)),
            pl.BlockSpec((Bb, Hp), lambda b, t: (b, 0)),
        ),
        compiler_params=pltpu.CompilerParams(
            # Batch blocks are independent (megacore on v7x); time is sequential.
            dimension_semantics=("parallel", "arbitrary"),
            vmem_limit_bytes=100 * 1024 * 1024),
    )(gx, w_hh_bf, h0_p, c0_p, mask_p)


def lstm_layer(gx, w_hh_bf, h0_p, c0_p, mask_p, nb, max_tc=16):
    """Full-sequence LSTM layer.  Handles T % tc != 0 with one tail call."""
    T = gx.shape[0]
    tc = min(T, max_tc)
    main = (T // tc) * tc
    try:
        call = functools.partial(_lstm_call, single_buffer=True)
        y, yd, h, c = call(gx[:main], w_hh_bf, h0_p, c0_p, mask_p, tc, nb)
    except Exception:
        # Fallback if this jax version rejects single-buffered BlockSpecs.
        call = functools.partial(_lstm_call, single_buffer=False)
        y, yd, h, c = call(gx[:main], w_hh_bf, h0_p, c0_p, mask_p, tc, nb)
    if main < T:
        y2, yd2, h, c = call(gx[main:], w_hh_bf, h, c, mask_p, T - main, nb)
        y = jnp.concatenate([y, y2], axis=0)
        yd = jnp.concatenate([yd, yd2], axis=0)
    return y, yd, h, c


# ------------------------ gate packing / padding ----------------------------

def _pack_gates_2d(w, H, Hp, Ip=None):
    """w: (I, 4H), PyTorch gate column order (i, f, g, o).
    Returns (Ip, 4Hp) with gate order (i, f, o, g), each gate padded to Hp."""
    I = w.shape[0]
    Ip = I if Ip is None else Ip
    gi, gf, gg, go = (w[:, k * H:(k + 1) * H] for k in range(4))

    def pad(g):
        return jnp.pad(g, ((0, Ip - I), (0, Hp - H)))

    return jnp.concatenate([pad(gi), pad(gf), pad(go), pad(gg)], axis=1)


def _pack_gates_1d(b, H, Hp):
    gi, gf, gg, go = (b[k * H:(k + 1) * H] for k in range(4))

    def pad(g):
        return jnp.pad(g, (0, Hp - H))

    return jnp.concatenate([pad(gi), pad(gf), pad(go), pad(gg)], axis=0)


# ------------------------------ dropout glue --------------------------------

def element_dropout(w, p, key, training=True):
    """F.dropout semantics (WeightDrop / DropConnect on packed weight_hh)."""
    if (not training) or p == 0.0:
        return w
    mask = jax.random.bernoulli(key, 1.0 - p, w.shape).astype(w.dtype)
    return w * mask / (1.0 - p)


def embedding_dropout(emb, p, key, training=True):
    """Drop whole embedding rows and rescale (AWD-LSTM embed_dropout)."""
    if (not training) or p == 0.0:
        return emb
    V = emb.shape[0]
    mask = jax.random.bernoulli(key, 1.0 - p, (V, 1)).astype(emb.dtype)
    return emb * mask / (1.0 - p)


def _vd_mask(key, p, B, H, Bp, Hp, training):
    """VariationalDropout mask over (batch, feature), constant over time."""
    if (not training) or p == 0.0:
        return jnp.ones((Bp, Hp), jnp.float32)
    m = (jax.random.bernoulli(key, 1.0 - p, (B, H)).astype(jnp.float32)
         / (1.0 - p))
    return jnp.pad(m, ((0, Bp - B), (0, Hp - H)))


# --------------------------- params / forward -------------------------------

def init_params(key, vocab, embed_dim, m, h_size, n_layers):
    keys = jax.random.split(key, 2 + 4 * n_layers)
    params = {}
    # TODO(synk): Adaptive_Tied_Input_Softmax source not provided; using a
    # single tied embedding table for get_embeds / get_logits.
    params['emb'] = jax.random.normal(keys[0], (vocab, embed_dim),
                                      jnp.float32) * 0.1
    # TODO(synk): DeFINE (hierarchical group-linear transform) source not
    # provided; realized as a single linear projection embed_dim -> m.
    params['define_w'] = jax.random.normal(keys[1], (embed_dim, m),
                                           jnp.float32) * 0.1
    params['define_b'] = jnp.zeros((m,), jnp.float32)

    lstms = []
    for i in range(n_layers):
        in_dim = m if i == 0 else h_size
        out_dim = h_size if i != n_layers - 1 else embed_dim
        Hp = _round_up(out_dim, 128)
        # Layer 0 sees the un-padded DeFINE width m; deeper layers see the
        # previous layer's 128-padded hidden width.
        Ip = in_dim if i == 0 else _round_up(in_dim, 128)
        k = keys[2 + 4 * i: 2 + 4 * (i + 1)]
        scale = 1.0 / math.sqrt(float(out_dim))
        w_ih = jax.random.uniform(k[0], (in_dim, 4 * out_dim), jnp.float32,
                                  -scale, scale)
        w_hh = jax.random.uniform(k[1], (out_dim, 4 * out_dim), jnp.float32,
                                  -scale, scale)
        b_ih = jax.random.uniform(k[2], (4 * out_dim,), jnp.float32,
                                  -scale, scale)
        b_hh = jax.random.uniform(k[3], (4 * out_dim,), jnp.float32,
                                  -scale, scale)
        # Pre-packed, lane-aligned, gate order (i,f,o,g).  Padded gate columns
        # and biases are zero -> padded hidden lanes of h/c stay exactly zero.
        lstms.append(dict(
            H=out_dim, Hp=Hp,
            w_ih_p=_pack_gates_2d(w_ih, out_dim, Hp, Ip=Ip).astype(jnp.bfloat16),
            w_hh_p=_pack_gates_2d(w_hh, out_dim, Hp, Ip=Hp),   # f32 master
            bias_p=_pack_gates_1d(b_ih + b_hh, out_dim, Hp),
        ))
    params['lstms'] = lstms
    return params


def awd_lstm_forward(params, tokens, hidden, rng,
                     dropouti, dropouth, dropout, dropout_embed, dropout_wei,
                     training=True, max_tc=16):
    B, T = tokens.shape
    n_layers = len(params['lstms'])
    keys = jax.random.split(rng, 3 + 2 * n_layers)
    kd_embed, kd_in, kd_out = keys[0], keys[1], keys[2]
    layer_keys = keys[3:]

    Bp, nb = _batch_layout(B)

    # embeddings.embed_dropout + time-major get_embeds (no activation transpose)
    emb_table = embedding_dropout(params['emb'], dropout_embed, kd_embed,
                                  training).astype(jnp.bfloat16)
    embeds = jnp.take(emb_table, tokens.T, axis=0)            # (T, B, E)
    E = embeds.shape[-1]
    m = params['define_w'].shape[1]

    # DeFINE projection: bf16 matmul with bias fused in the epilogue.
    proj = pallas_matmul(embeds.reshape(T * B, E), params['define_w'],
                         bias=params['define_b'], out_dtype=jnp.bfloat16)
    x = proj.reshape(T, B, m)

    # dropouti (variational over time): single broadcast multiply.
    if training and dropouti > 0.0:
        mask_i = (jax.random.bernoulli(kd_in, 1.0 - dropouti, (1, B, m))
                  .astype(x.dtype) / (1.0 - dropouti))
        x = x * mask_i
    x = jnp.pad(x, ((0, 0), (0, Bp - B), (0, 0)))             # (T, Bp, m) bf16

    raw_outputs, outputs, new_hidden = [], [], []
    out_drop_bt = None
    for i, lp in enumerate(params['lstms']):
        k_wd, k_vd = layer_keys[2 * i], layer_keys[2 * i + 1]
        H, Hp = lp['H'], lp['Hp']
        Ip = x.shape[-1]

        # WeightDrop: single fused multiply + cast over the pre-packed weights.
        w_hh_bf = element_dropout(lp['w_hh_p'], dropout_wei, k_wd,
                                  training).astype(jnp.bfloat16)

        # Hoisted input projection over all T*Bp rows, bias fused, bf16 stream.
        gx = pallas_matmul(x.reshape(T * Bp, Ip), lp['w_ih_p'],
                           bias=lp['bias_p'], out_dtype=jnp.bfloat16)
        gx = gx.reshape(T, Bp, 4 * Hp)

        h0, c0 = hidden[i]
        h0_p = jnp.pad(h0, ((0, Bp - B), (0, Hp - H)))
        c0_p = jnp.pad(c0, ((0, Bp - B), (0, Hp - H)))

        # Variational dropout mask for this layer's output, applied in-kernel.
        p_drop = dropouth if i != n_layers - 1 else dropout
        k_drop = k_vd if i != n_layers - 1 else kd_out
        mask_p = _vd_mask(k_drop, p_drop, B, H, Bp, Hp, training)

        y, yd, hT, cT = lstm_layer(gx, w_hh_bf, h0_p, c0_p, mask_p, nb, max_tc)

        raw_outputs.append(jnp.transpose(y[:, :B, :H], (1, 0, 2)))   # (B,T,H)
        new_hidden.append((hT[:B, :H], cT[:B, :H]))

        if i != n_layers - 1:
            x = yd                               # bf16 (T, Bp, Hp) feeds next layer
            outputs.append(jnp.transpose(yd[:, :B, :H], (1, 0, 2))
                           .astype(jnp.float32))
        else:
            out_drop_bt = jnp.transpose(yd[:, :B, :H], (1, 0, 2))    # (B,T,E) bf16
            outputs.append(out_drop_bt.astype(jnp.float32))

    # embeddings.get_logits: tied projection onto the embedding table.
    # emb.T is materialized once (bf16) so no per-tile transposes in the matmul.
    V = params['emb'].shape[0]
    emb_t = params['emb'].astype(jnp.bfloat16).T                     # (E, V)
    logits = pallas_matmul(out_drop_bt.reshape(B * T, E), emb_t,
                           out_dtype=jnp.float32)
    # TODO(synk): for production, fuse softmax/cross-entropy into the logits
    # matmul epilogue (or emit bf16 logits) to cut the (B*T, V) f32 store.
    logits = logits.reshape(B, T, V)
    return logits, new_hidden, raw_outputs, outputs


# --------------------------------- main --------------------------------------

if __name__ == "__main__":
    B, T = 2, 8
    embed_dim, m, h_size, vocab = 32, 32, 32, 32
    n_layers = 3
    dropouti = dropouth = drop_out = dropout_embed = dropout_wei = 0.1

    key = jax.random.PRNGKey(0)
    kp, kt, kh, kd = jax.random.split(key, 4)
    params = init_params(kp, vocab, embed_dim, m, h_size, n_layers)

    tokens = jax.random.randint(kt, (B, T), 0, vocab, dtype=jnp.int32)

    hidden = []
    hkeys = jax.random.split(kh, 2 * n_layers)
    for i in range(n_layers):
        H = h_size if i != n_layers - 1 else embed_dim
        hidden.append((jax.random.normal(hkeys[2 * i], (B, H), jnp.float32) * 0.1,
                       jax.random.normal(hkeys[2 * i + 1], (B, H), jnp.float32) * 0.1))

    logits, new_hidden, raw_outputs, outputs = awd_lstm_forward(
        params, tokens, hidden, kd,
        dropouti=dropouti, dropouth=dropouth, dropout=drop_out,
        dropout_embed=dropout_embed, dropout_wei=dropout_wei, training=True)

    jax.block_until_ready(logits)
    for h, c in new_hidden:
        jax.block_until_ready(h)
        jax.block_until_ready(c)
    for arr in raw_outputs + outputs:
        jax.block_until_ready(arr)

    assert logits.shape == (B, T, vocab)
    assert all(h.shape == hid[0].shape and c.shape == hid[1].shape
               for (h, c), hid in zip(new_hidden, hidden))
    print("KERNEL_OK")
</pallas_src>

<mosaic_0001>
module attributes {stable_mosaic.version = 11 : i64} {
  func.func @_matmul_bias_kernel(%arg0: i32, %arg1: i32, %arg2: i32, %arg3: memref<16x128xbf16, #tpu.memory_space<vmem>>, %arg4: memref<128x128xbf16, #tpu.memory_space<vmem>>, %arg5: memref<1x128xf32, #tpu.memory_space<vmem>>, %arg6: memref<16x128xbf16, #tpu.memory_space<vmem>>, %arg7: memref<16x128xf32, #tpu.memory_space<vmem>>) attributes {dimension_semantics = [#tpu.dimension_semantics<parallel>, #tpu.dimension_semantics<parallel>, #tpu.dimension_semantics<arbitrary>], iteration_bounds = array<i64: 1, 1, 1>, scalar_prefetch = 0 : i64, scratch_operands = 1 : i64, tpu.core_type = #tpu.core_type<tc>, window_params = [{transform_indices = @transform_0, window_bounds = array<i64: 16, 128>}, {transform_indices = @transform_1, window_bounds = array<i64: 128, 128>}, {transform_indices = @transform_2, window_bounds = array<i64: 1, 128>}, {transform_indices = @transform_3, window_bounds = array<i64: 16, 128>}]} {
    %c0_i32 = arith.constant 0 : i32
    %0 = arith.cmpi eq, %arg2, %c0_i32 : i32
    %1 = arith.extui %0 : i1 to i32
    %c0_i32_0 = arith.constant 0 : i32
    %2 = arith.cmpi ne, %1, %c0_i32_0 : i32
    scf.if %2 {
      %cst_10 = arith.constant 0.000000e+00 : f32
      %12 = vector.broadcast %cst_10 : f32 to vector<16x128xf32>
      %c0_11 = arith.constant 0 : index
      %c0_12 = arith.constant 0 : index
      %13 = vector.load %arg7[%c0_11, %c0_12] : memref<16x128xf32, #tpu.memory_space<vmem>>, vector<16x128xf32>
      tpu.vector_store %arg7[%c0_11, %c0_12], %12 {strides = array<i32>} : memref<16x128xf32, #tpu.memory_space<vmem>>, vector<16x128xf32>,
    } else {
    }
    %c0 = arith.constant 0 : index
    %c0_1 = arith.constant 0 : index
    %3 = vector.load %arg7[%c0, %c0_1] : memref<16x128xf32, #tpu.memory_space<vmem>>, vector<16x128xf32>
    %c0_2 = arith.constant 0 : index
    %c0_3 = arith.constant 0 : index
    %4 = vector.load %arg3[%c0_2, %c0_3] : memref<16x128xbf16, #tpu.memory_space<vmem>>, vector<16x128xbf16>
    %c0_4 = arith.constant 0 : index
    %c0_5 = arith.constant 0 : index
    %5 = vector.load %arg4[%c0_4, %c0_5] : memref<128x128xbf16, #tpu.memory_space<vmem>>, vector<128x128xbf16>
    %cst = arith.constant dense<0.000000e+00> : vector<16x128xf32>
    %6 = tpu.matmul %4, %5, %cst {dimension_numbers = #tpu.dot_dimension_numbers<[1], [0], [0], [1], [0, 0, 1, 1], [], []>} : vector<16x128xbf16>, vector<128x128xbf16>, vector<16x128xf32> -> vector<16x128xf32>
    %7 = arith.addf %3, %6 : vector<16x128xf32>
    %c0_6 = arith.constant 0 : index
    %c0_7 = arith.constant 0 : index
    %8 = vector.load %arg7[%c0_6, %c0_7] : memref<16x128xf32, #tpu.memory_space<vmem>>, vector<16x128xf32>
    tpu.vector_store %arg7[%c0_6, %c0_7], %7 {strides = array<i32>} : memref<16x128xf32, #tpu.memory_space<vmem>>, vector<16x128xf32>,
    %c0_i32_8 = arith.constant 0 : i32
    %9 = arith.cmpi eq, %arg2, %c0_i32_8 : i32
    %10 = arith.extui %9 : i1 to i32
    %c0_i32_9 = arith.constant 0 : i32
    %11 = arith.cmpi ne, %10, %c0_i32_9 : i32
    scf.if %11 {
      %c0_10 = arith.constant 0 : index
      %c0_11 = arith.constant 0 : index
      %12 = vector.load %arg7[%c0_10, %c0_11] : memref<16x128xf32, #tpu.memory_space<vmem>>, vector<16x128xf32>
      %c0_12 = arith.constant 0 : index
      %c0_13 = arith.constant 0 : index
      %13 = vector.load %arg5[%c0_12, %c0_13] : memref<1x128xf32, #tpu.memory_space<vmem>>, vector<1x128xf32>
      %14 = vector.broadcast %13 : vector<1x128xf32> to vector<16x128xf32>
      %15 = arith.addf %12, %14 : vector<16x128xf32>
      %16 = arith.truncf %15 : vector<16x128xf32> to vector<16x128xbf16>
      %c0_14 = arith.constant 0 : index
      %c0_15 = arith.constant 0 : index
      %17 = vector.load %arg6[%c0_14, %c0_15] : memref<16x128xbf16, #tpu.memory_space<vmem>>, vector<16x128xbf16>
      tpu.vector_store %arg6[%c0_14, %c0_15], %16 {strides = array<i32>} : memref<16x128xbf16, #tpu.memory_space<vmem>>, vector<16x128xbf16>,
    } else {
    }
    return
  }
  func.func @transform_0(%arg0: i32, %arg1: i32, %arg2: i32) -> (i32, i32) {
    %c0_i32 = arith.constant 0 : i32
    return %arg0, %arg2 : i32, i32
  }
  func.func @transform_1(%arg0: i32, %arg1: i32, %arg2: i32) -> (i32, i32) {
    %c0_i32 = arith.constant 0 : i32
    return %arg2, %arg1 : i32, i32
  }
  func.func @transform_2(%arg0: i32, %arg1: i32, %arg2: i32) -> (i32, i32) {
    %c0_i32 = arith.constant 0 : i32
    %c0_i32_0 = arith.constant 0 : i32
    return %c0_i32, %arg1 : i32, i32
  }
  func.func @transform_3(%arg0: i32, %arg1: i32, %arg2: i32) -> (i32, i32) {
    %c0_i32 = arith.constant 0 : i32
    return %arg0, %arg1 : i32, i32
  }
}

</mosaic_0001>

<bundles_post_ra>
// kernel: tpu_custom_call.1
= control target key start
LH: loop header
LB: loop body
LE: loop exit
PB: predicated region body
PF: predicated region fallthrough
CT: control target
= control target key end

     0   :  { %8 = vsyncpa [#allocation4], 0  ;;  %s422_s0 = inlined_call_operand.hbm [shape: bf16[16,128], index: 0, kind: input, shape index: {}]   ;;  %s423_s1 = inlined_call_operand.hbm [shape: bf16[128,128], index: 1, kind: input, shape index: {}]   ;;  %s424_s2 = inlined_call_operand.vmem [shape: f32[1,128], index: 2, kind: input, shape index: {}]   ;;  %s425_s3 = inlined_call_operand.hbm [shape: bf16[16,128], index: 3, kind: output, shape index: {}]  }
   0x1   :  { %9 = vsyncpa [#allocation7], 0 }
   0x2   :  { %10 = vsyncpa [#allocation5], 0  ;;  %s347_s12 = smov [#allocation3]   ;;  %s275_s16 = scalar_lea.hbm %s422_s0, 128 }
   0x3   :  { %s16_s13 = sshll.u32 %s347_s12, 4  ;;  %p276_p0 = scmp.ne.s32.totalorder %s422_s0, %s275_s16  ;;  %s17_s13 = int_to_ptr.vmem [resolvable:$true] %s16_s13 }
   0x4   :  { %p279_p1 = scmp.lt.u32.totalorder %s275_s16, %s422_s0 }
   0x6   :  { %p281_p2 = pnand %p279_p1, %p276_p0 }
   0x8   :  { %284 = shalt.err (!%p281_p2)
}
   0x9   :  { %s285_s21 = scalar_lea.vmem %s17_s13, 128  ;;  %p290_p4 = scmp.lt.s32.totalorder %s17_s13, %s17_s13 }
   0xa   :  { %p286_p3 = scmp.ne.s32.totalorder %s17_s13, %s285_s21  ;;  %p291_p5 = scmp.lt.s32.totalorder %s285_s21, %s285_s21 }
   0xc   :  { %p292_p6 = por %p291_p5, %p290_p4 }
   0xe   :  { %p293_p7 = pnand %p292_p6, %p286_p3 }
  0x10   :  { %296 = shalt.err (!%p293_p7)
}
  0x11   :  { %s348_s22 = smov 64   ;;  %s349_s23 = smov 4  }
  0x12   :  { %22 = dma.hbm_to_vmem [thread:$0]  %s422_s0, 128, %s17_s13, [#allocation4], %s348_s22, %s348_s22, %s349_s23  }
  0x13   :  { %s350_s26 = smov [#allocation6]   ;;  %s297_s30 = scalar_lea.hbm %s423_s1, 1024 }
  0x14   :  { %s28_s27 = sshll.u32 %s350_s26, 4  ;;  %p298_p8 = scmp.ne.s32.totalorder %s423_s1, %s297_s30  ;;  %s29_s27 = int_to_ptr.vmem [resolvable:$true] %s28_s27 }
  0x15   :  { %p301_p9 = scmp.lt.u32.totalorder %s297_s30, %s423_s1 }
  0x17   :  { %p303_p10 = pnand %p301_p9, %p298_p8 }
  0x19   :  { %306 = shalt.err (!%p303_p10)
}
  0x1a   :  { %s307_s8 = scalar_lea.vmem %s29_s27, 1024  ;;  %p312_p12 = scmp.lt.s32.totalorder %s29_s27, %s29_s27 }
  0x1b   :  { %p308_p11 = scmp.ne.s32.totalorder %s29_s27, %s307_s8  ;;  %p313_p13 = scmp.lt.s32.totalorder %s307_s8, %s307_s8 }
  0x1d   :  { %p314_p0 = por %p313_p13, %p312_p12 }
  0x1f   :  { %p315_p1 = pnand %p314_p0, %p308_p11 }
  0x21   :  { %318 = shalt.err (!%p315_p1)
}
  0x22   :  { %34 = dma.hbm_to_vmem [thread:$0]  %s423_s1, 1024, %s29_s27, [#allocation7], %s348_s22, %s348_s22, %s349_s23  }
  0x23   :  { %341 = dma.done.wait [#allocation4], 128  }
  0x24   :  { %342 = vsyncadd [#allocation4], 4294967168 }
  0x25   :  { %343 = dma.done.wait [#allocation7], 1024  }
  0x26   :  { %344 = vsyncadd [#allocation7], 4294966272  ;;  %v351_v0 = vmov 0.0   ;;  %vm352_vm0 = vmmov 0   ;;  %v266_v1 = vld [vmem:[#allocation6] sm:$0xff]   ;;  %v267_v2 = vld [vmem:[#allocation6 + $0x8] sm:$0xff]  }
  0x27   :  { %239 = vmatprep.subr.bf16.mxu0 %v351_v0  ;;  %255 = vmatprep.mubr.msk.bf16.mxu0 %vm352_vm0, %v351_v0  ;;  %v268_v3 = vld [vmem:[#allocation6 + $0x10] sm:$0xff]   ;;  %v269_v4 = vld [vmem:[#allocation6 + $0x18] sm:$0xff]   ;;  %v270_v5 = vld [vmem:[#allocation6 + $0x20] sm:$0xff]   ;;  %s353_s11 = smov [#allocation8]  }
  0x28   :  { %240 = vmatpush3.bf16.msra.mxu0 %v266_v1  ;;  %v271_v6 = vld [vmem:[#allocation6 + $0x28] sm:$0xff]   ;;  %v272_v7 = vld [vmem:[#allocation6 + $0x30] sm:$0xff]   ;;  %v273_v8 = vld [vmem:[#allocation6 + $0x38] sm:$0xff]   ;;  %s198_s12 = sshll.u32 %s353_s11, 4  ;;  %s199_s12 = int_to_ptr.vmem [resolvable:$true] %s198_s12 }
  0x29   :  { %241 = vmatprep.subr.bf16.mxu0 %v351_v0  ;;  %v274_v9 = vld [vmem:[#allocation3] sm:$0xff]   ;;  %s319_s13 = scalar_lea.vmem %s199_s12, 128  ;;  %p324_p3 = scmp.lt.s32.totalorder %s199_s12, %s199_s12 }
  0x2a   :  { %v220_v11 = vld [vmem:[%s424_s2] ss:$0 sm:$0xff]  ;;  %p320_p2 = scmp.ne.s32.totalorder %s199_s12, %s319_s13  ;;  %p325_p4 = scmp.lt.s32.totalorder %s319_s13, %s319_s13 }
  0x2c   :  { %242 = vmatpush3.bf16.msra.mxu0 %v267_v2  ;;  %p326_p5 = por %p325_p4, %p324_p3 }
  0x2d   :  { %243 = vmatprep.subr.bf16.mxu0 %v351_v0 }
  0x2e   :  { %p327_p6 = pnand %p326_p5, %p320_p2 }
  0x30   :  { %244 = vmatpush3.bf16.msra.mxu0 %v268_v3 }
  0x31   :  { %245 = vmatprep.subr.bf16.mxu0 %v351_v0 }
  0x34   :  { %246 = vmatpush3.bf16.msra.mxu0 %v269_v4 }
  0x35   :  { %247 = vmatprep.subr.bf16.mxu0 %v351_v0 }
  0x38   :  { %248 = vmatpush3.bf16.msra.mxu0 %v270_v5 }
  0x39   :  { %249 = vmatprep.subr.bf16.mxu0 %v351_v0 }
  0x3c   :  { %250 = vmatpush3.bf16.msra.mxu0 %v271_v6 }
  0x3d   :  { %251 = vmatprep.subr.bf16.mxu0 %v351_v0 }
  0x40   :  { %252 = vmatpush3.bf16.msra.mxu0 %v272_v7 }
  0x41   :  { %253 = vmatprep.subr.bf16.mxu0 %v351_v0 }
  0x44   :  { %254 = vmatpush3.bf16.msra.mxu0 %v273_v8 }
  0x47   :  { %256 = vmatmul.mubr.bf16.vlgmr.msra.gmra.mrb[0].mxu0 %v274_v9 }
 0x11a   :  { %v158_v10 = vpop.f32.mrb[0].mxu0 }
 0x11b   :  { %v257_v12 = vpop.f32.mrb[1].mxu0  ;;  %v181_v14 = vadd.f32 %v220_v11, %v158_v10 }
 0x11c   :  { %v161_v13 = vpop.f32.mrb[2].mxu0 }
 0x11d   :  { %v182_v15 = vadd.f32 %v220_v11, %v161_v13  ;;  %v258_v16 = vpop.f32.mrb[3].mxu0 }
 0x11f   :  { %v228_v17 = vpack.c.bf16 %v182_v15, %v181_v14 }
 0x121   :  { %229 = vst [vmem:[#allocation8] sm:$0xff] %v228_v17  }
 0x122   :  { %330 = shalt.err (!%p327_p6)
}
 0x123   :  { %s331_s2 = scalar_lea.hbm %s425_s3, 128 }
 0x124   :  { %p332_p7 = scmp.ne.s32.totalorder %s425_s3, %s331_s2  ;;  %p335_p8 = scmp.lt.u32.totalorder %s331_s2, %s425_s3 }
 0x126   :  { %p337_p9 = pnand %p335_p8, %p332_p7 }
 0x128   :  { %340 = shalt.err (!%p337_p9)
}
 0x129   :  { %204 = dma.vmem_to_hbm [thread:$0]  %s199_s12, 128, %s425_s3, [#allocation5], %s348_s22, %s348_s22, %s349_s23  }
 0x12a   :  { %345 = dma.done.wait [#allocation5], 128  }
 0x12b   :  { %346 = vsyncadd [#allocation5], 4294967168 }
 0x12c   :  { %208 = vsyncpa [#allocation4], 1 }
 0x12d   :  { %209 = vsyncpa [#allocation7], 1 }
 0x12e   :  { %210 = vsyncpa [#allocation5], 1 }

</bundles_post_ra>
